<compile_context>
chip_gen: v7x
topology: tpu7x:2x2x1
jax: 0.10.0
libtpu: 0.0.40
codegen_flags: <defaults>
</compile_context>

<pallas_src>
from enum import Enum

import jax
import jax.numpy as jnp
from jax.experimental import pallas as pl
from jax.experimental.pallas import tpu as pltpu

SUBLANE = 8  # TPU sublane width (second-to-last dim granularity)


class Perturb(Enum):
    NONE = 0
    PREV = 1
    NEXT = 2


def _round_up(x, m):
    return (x + m - 1) // m * m


def _cdiv(a, b):
    return -(-a // b)


# ----------------------------------------------------------------------------
# Kernel: one (TB, D) batch tile of  tanh(h @ W1 + b1 + t*wt) @ W2 + b2
# for evaluation index n = program_id(0).  Weights/biases VMEM-resident.
# ----------------------------------------------------------------------------
def _base_func_kernel(t_ref, h_ref, w1_ref, b1_ref, wt_ref, w2_ref, b2_ref,
                      o_ref):
    t = t_ref[pl.program_id(0)]                      # f32 scalar from SMEM
    # Cast to bf16 in-kernel (saves a wrapper-side HBM pass); MXU, f32 acc.
    hb = h_ref[...].astype(jnp.bfloat16)
    z = jnp.dot(hb, w1_ref[...], preferred_element_type=jnp.float32)
    # Time term folded into one (1, H) f32 bias row; tanh on the EUP in f32
    # (v5e has no bf16 VPU/EUP; this path is not the bottleneck on v6e/v7x).
    a = jnp.tanh(z + (b1_ref[...] + t * wt_ref[...]))
    out = jnp.dot(a.astype(jnp.bfloat16), w2_ref[...],
                  preferred_element_type=jnp.float32)
    o_ref[...] = (out + b2_ref[...]).astype(o_ref.dtype)


# ----------------------------------------------------------------------------
# Parameter preparation (once, outside the hot loop).  Weights bf16 (MXU input
# dtype, halves weight DMA); biases f32 rows.  No padding needed: weight blocks
# equal the full array dims, which is always a legal BlockSpec.
# TODO(synk): if D/H grow past 128 and the kernel turns compute-bound, pad the
# contraction dims to multiples of 256 on v6e/v7x (2x256x256 MXU) / 128 on v5e.
# ----------------------------------------------------------------------------
def prepare_params(params, mxu_dtype=jnp.bfloat16):
    w1, b1, wt, w2, b2 = params
    D, H = w1.shape
    return {
        "w1": w1.astype(mxu_dtype),                      # (D, H)
        "b1": jnp.reshape(b1, (1, H)).astype(jnp.float32),
        "wt": jnp.reshape(wt, (1, H)).astype(jnp.float32),
        "w2": w2.astype(mxu_dtype),                      # (H, D)
        "b2": jnp.reshape(b2, (1, D)).astype(jnp.float32),
        "D": int(D),
        "H": int(H),
    }


def _vmem_capacity_bytes():
    try:
        return int(pltpu.get_tpu_info().vmem_capacity_bytes)
    except Exception:
        return 64 << 20  # conservative (v7x per-TC physical VMEM)


def _select_tb(B, tb_max):
    """Batch tile: minimal dead rows, >=2 tiles when possible (v7x megacore)."""
    min_tiles = 2 if B >= 2 * SUBLANE else 1
    n_tiles = max(_cdiv(B, max(tb_max, SUBLANE)), min_tiles)
    TB = _round_up(_cdiv(B, n_tiles), SUBLANE)
    if TB >= B:
        return B, 1            # one full-height tile (block dim == array dim)
    return TB, _cdiv(B, TB)


# ----------------------------------------------------------------------------
# One pallas_call covering N independent evaluations (leading grid axis) and
# the batch tiling on the second axis.
# ----------------------------------------------------------------------------
def _base_func_pallas(t_vals, h_stack, prepared, *, tb_max=2048):
    N, B, D = h_stack.shape
    H = prepared["H"]
    assert D == prepared["D"], "state dim mismatch with prepared params"

    out_dtype = h_stack.dtype
    in_bytes = jnp.dtype(h_stack.dtype).itemsize
    out_bytes = jnp.dtype(out_dtype).itemsize

    # Per-generation VMEM budget (v7x 64 MiB physical, v5e/v6e 128 MiB).
    cap = _vmem_capacity_bytes()
    hi = min((3 * cap) // 4, 112 << 20)
    weight_bytes = 2 * (2 * D * H * 2 + 3 * max(D, H) * 4)     # 2x-buf worst case
    row_bytes = 2 * D * in_bytes + 2 * D * out_bytes + 2 * H * 4
    rows_budget = max((hi // 2 - weight_bytes) // max(row_bytes, 1), SUBLANE)
    tb_cap = max((rows_budget // SUBLANE) * SUBLANE, SUBLANE)

    TB, n_tiles = _select_tb(B, min(tb_max, int(tb_cap)))

    budget = 2 * TB * D * (in_bytes + out_bytes) + weight_bytes + 2 * TB * H * 4
    vmem_limit = int(min(max(2 * budget, 32 << 20), hi))

    w1p, b1p, wtp, w2p, b2p = (prepared[k] for k in ("w1", "b1", "wt", "w2",
                                                     "b2"))

    # Note: if B % TB != 0, the boundary tile's out-of-range rows are undefined
    # on read and their writes are dropped by Pallas — rows are independent, so
    # real outputs are unaffected and no explicit row padding pass is needed.
    return pl.pallas_call(
        _base_func_kernel,
        out_shape=jax.ShapeDtypeStruct((N, B, D), out_dtype),
        grid=(N, n_tiles),
        in_specs=[
            pl.BlockSpec(memory_space=pltpu.MemorySpace.SMEM),      # t values
            pl.BlockSpec((None, TB, D), lambda n, i: (n, i, 0)),    # h tile
            pl.BlockSpec((D, H), lambda n, i: (0, 0)),              # W1 resident
            pl.BlockSpec((1, H), lambda n, i: (0, 0)),              # b1 resident
            pl.BlockSpec((1, H), lambda n, i: (0, 0)),              # wt resident
            pl.BlockSpec((H, D), lambda n, i: (0, 0)),              # W2 resident
            pl.BlockSpec((1, D), lambda n, i: (0, 0)),              # b2 resident
        ],
        out_specs=pl.BlockSpec((None, TB, D), lambda n, i: (n, i, 0)),
        compiler_params=pltpu.CompilerParams(
            dimension_semantics=("parallel", "parallel"),  # v7x: both TCs busy
            vmem_limit_bytes=vmem_limit,
        ),
    )(t_vals, h_stack, w1p, b1p, wtp, w2p, b2p)


# ----------------------------------------------------------------------------
# _PerturbFunc_mgn.forward equivalents
# ----------------------------------------------------------------------------
def _apply_perturb(t, dtype, perturb):
    t = jnp.asarray(t).astype(dtype)                 # matches t.to(h.dtype)
    if perturb is Perturb.NEXT:
        t = jnp.nextafter(t, t + 1)
    elif perturb is Perturb.PREV:
        t = jnp.nextafter(t, t - 1)
    # TODO(synk): _StitchGradient only changes the backward pass (identity
    # forward); nothing extra is needed for forward semantics.
    return t


def perturb_func_mgn_forward(t, h, prepared, *, perturb=Perturb.NONE,
                             tb_max=2048):
    assert isinstance(perturb, Perturb), \
        "perturb argument must be of type Perturb enum"
    t = _apply_perturb(t, h.dtype, perturb)
    t_vals = jnp.reshape(t, (1,)).astype(jnp.float32)    # SMEM scalar is 32-bit
    out = _base_func_pallas(t_vals, h[None], prepared, tb_max=tb_max)
    return out[0]


def perturb_func_mgn_forward_many(ts, hs, prepared, *, perturb=Perturb.NONE,
                                  tb_max=2048):
    """N independent (t, h) evaluations in one pallas_call (weights resident)."""
    assert isinstance(perturb, Perturb), \
        "perturb argument must be of type Perturb enum"
    ts = _apply_perturb(ts, hs.dtype, perturb)
    t_vals = jnp.reshape(ts, (-1,)).astype(jnp.float32)
    return _base_func_pallas(t_vals, hs, prepared, tb_max=tb_max)


# ----------------------------------------------------------------------------
# Pure-JAX references for correctness checking.
# ----------------------------------------------------------------------------
def _reference_f32(t, h, params, *, perturb=Perturb.NONE):
    t = jnp.float32(_apply_perturb(t, h.dtype, perturb))
    w1, b1, wt, w2, b2 = params
    hf = h.astype(jnp.float32)
    return (jnp.tanh(hf @ w1 + b1 + t * wt) @ w2 + b2).astype(h.dtype)


def _reference_bf16_mxu(t, h, params, *, perturb=Perturb.NONE):
    # Mirrors kernel numerics: bf16 matmul inputs, f32 acc, f32 elementwise.
    t = jnp.float32(_apply_perturb(t, h.dtype, perturb))
    w1, b1, wt, w2, b2 = params
    bf = jnp.bfloat16
    z = jnp.dot(h.astype(bf), w1.astype(bf),
                preferred_element_type=jnp.float32)
    a = jnp.tanh(z + b1 + t * wt)
    out = jnp.dot(a.astype(bf), w2.astype(bf),
                  preferred_element_type=jnp.float32)
    return (out + b2).astype(h.dtype)


if __name__ == "__main__":
    B, D, H = 8, 32, 32  # batch, state dim, hidden dim
    key = jax.random.PRNGKey(0)
    k_h, k_w1, k_b1, k_wt, k_w2, k_b2, k_hs = jax.random.split(key, 7)

    h = jax.random.normal(k_h, (B, D), dtype=jnp.float32)
    w1 = jax.random.normal(k_w1, (D, H), dtype=jnp.float32) * 0.1
    b1 = jax.random.normal(k_b1, (1, H), dtype=jnp.float32) * 0.1
    wt = jax.random.normal(k_wt, (1, H), dtype=jnp.float32) * 0.1
    w2 = jax.random.normal(k_w2, (H, D), dtype=jnp.float32) * 0.1
    b2 = jax.random.normal(k_b2, (1, D), dtype=jnp.float32) * 0.1
    params = (w1, b1, wt, w2, b2)
    prepared = prepare_params(params)

    t = jnp.float32(0.5)

    ok = True
    for mode in (Perturb.NONE, Perturb.NEXT, Perturb.PREV):
        out = perturb_func_mgn_forward(t, h, prepared, perturb=mode)
        out = jax.block_until_ready(out)
        ok = ok and (out.shape == (B, D)) and (out.dtype == h.dtype)
        # Tight check against the bf16-MXU-matched reference.
        ref_bf = _reference_bf16_mxu(t, h, params, perturb=mode)
        ok = ok and bool(jnp.allclose(out, ref_bf, atol=1e-3, rtol=1e-3))
        # Loose semantic check against the full-f32 reference.
        ref32 = _reference_f32(t, h, params, perturb=mode)
        ok = ok and bool(jnp.allclose(out, ref32, atol=3e-2, rtol=3e-2))

    # Batched multi-evaluation path (one pallas_call for N integrator sub-steps).
    N = 4
    hs = jax.random.normal(k_hs, (N, B, D), dtype=jnp.float32)
    ts = jnp.linspace(0.0, 1.0, N, dtype=jnp.float32)
    outs = perturb_func_mgn_forward_many(ts, hs, prepared, perturb=Perturb.NONE)
    outs = jax.block_until_ready(outs)
    ok = ok and (outs.shape == (N, B, D))
    for n in range(N):
        ref_n = _reference_bf16_mxu(ts[n], hs[n], params, perturb=Perturb.NONE)
        ok = ok and bool(jnp.allclose(outs[n], ref_n, atol=1e-3, rtol=1e-3))

    print("KERNEL_OK" if ok else "MISMATCH")
</pallas_src>

<mosaic_0001>
module attributes {stable_mosaic.version = 11 : i64} {
  func.func @_base_func_kernel(%arg0: i32, %arg1: i32, %arg2: memref<1xf32, #tpu.memory_space<smem>>, %arg3: memref<1x8x32xf32, #tpu.memory_space<vmem>>, %arg4: memref<32x32xbf16, #tpu.memory_space<vmem>>, %arg5: memref<1x32xf32, #tpu.memory_space<vmem>>, %arg6: memref<1x32xf32, #tpu.memory_space<vmem>>, %arg7: memref<32x32xbf16, #tpu.memory_space<vmem>>, %arg8: memref<1x32xf32, #tpu.memory_space<vmem>>, %arg9: memref<1x8x32xf32, #tpu.memory_space<vmem>>) attributes {dimension_semantics = [#tpu.dimension_semantics<parallel>, #tpu.dimension_semantics<parallel>], iteration_bounds = array<i64: 1, 1>, scalar_prefetch = 0 : i64, scratch_operands = 0 : i64, tpu.core_type = #tpu.core_type<tc>, window_params = [{transform_indices = @transform_0, window_bounds = array<i64: 1>}, {transform_indices = @transform_1, window_bounds = array<i64: 1, 8, 32>}, {pipeline_mode = #tpu.pipeline_mode<synchronous>, transform_indices = @transform_2, window_bounds = array<i64: 32, 32>}, {pipeline_mode = #tpu.pipeline_mode<synchronous>, transform_indices = @transform_3, window_bounds = array<i64: 1, 32>}, {pipeline_mode = #tpu.pipeline_mode<synchronous>, transform_indices = @transform_4, window_bounds = array<i64: 1, 32>}, {pipeline_mode = #tpu.pipeline_mode<synchronous>, transform_indices = @transform_5, window_bounds = array<i64: 32, 32>}, {pipeline_mode = #tpu.pipeline_mode<synchronous>, transform_indices = @transform_6, window_bounds = array<i64: 1, 32>}, {transform_indices = @transform_7, window_bounds = array<i64: 1, 8, 32>}]} {
    %0 = arith.index_cast %arg0 : i32 to index
    %1 = memref.load %arg2[%0] : memref<1xf32, #tpu.memory_space<smem>>
    %c0 = arith.constant 0 : index
    %c0_0 = arith.constant 0 : index
    %c0_1 = arith.constant 0 : index
    %2 = vector.load %arg3[%c0, %c0_0, %c0_1] : memref<1x8x32xf32, #tpu.memory_space<vmem>>, vector<1x8x32xf32>
    %3 = vector.shape_cast %2 : vector<1x8x32xf32> to vector<8x32xf32>
    %4 = arith.truncf %3 : vector<8x32xf32> to vector<8x32xbf16>
    %c0_2 = arith.constant 0 : index
    %c0_3 = arith.constant 0 : index
    %5 = vector.load %arg4[%c0_2, %c0_3] : memref<32x32xbf16, #tpu.memory_space<vmem>>, vector<32x32xbf16>
    %cst = arith.constant dense<0.000000e+00> : vector<8x32xf32>
    %6 = tpu.matmul %4, %5, %cst {dimension_numbers = #tpu.dot_dimension_numbers<[1], [0], [0], [1], [0, 0, 1, 1], [], []>} : vector<8x32xbf16>, vector<32x32xbf16>, vector<8x32xf32> -> vector<8x32xf32>
    %c0_4 = arith.constant 0 : index
    %c0_5 = arith.constant 0 : index
    %7 = vector.load %arg5[%c0_4, %c0_5] : memref<1x32xf32, #tpu.memory_space<vmem>>, vector<1x32xf32>
    %c0_6 = arith.constant 0 : index
    %c0_7 = arith.constant 0 : index
    %8 = vector.load %arg6[%c0_6, %c0_7] : memref<1x32xf32, #tpu.memory_space<vmem>>, vector<1x32xf32>
    %9 = vector.broadcast %1 : f32 to vector<1x32xf32>
    %10 = arith.mulf %9, %8 : vector<1x32xf32>
    %11 = arith.addf %7, %10 : vector<1x32xf32>
    %12 = vector.broadcast %11 : vector<1x32xf32> to vector<8x32xf32>
    %13 = arith.addf %6, %12 : vector<8x32xf32>
    %14 = math.tanh %13 : vector<8x32xf32>
    %15 = arith.truncf %14 : vector<8x32xf32> to vector<8x32xbf16>
    %c0_8 = arith.constant 0 : index
    %c0_9 = arith.constant 0 : index
    %16 = vector.load %arg7[%c0_8, %c0_9] : memref<32x32xbf16, #tpu.memory_space<vmem>>, vector<32x32xbf16>
    %cst_10 = arith.constant dense<0.000000e+00> : vector<8x32xf32>
    %17 = tpu.matmul %15, %16, %cst_10 {dimension_numbers = #tpu.dot_dimension_numbers<[1], [0], [0], [1], [0, 0, 1, 1], [], []>} : vector<8x32xbf16>, vector<32x32xbf16>, vector<8x32xf32> -> vector<8x32xf32>
    %c0_11 = arith.constant 0 : index
    %c0_12 = arith.constant 0 : index
    %18 = vector.load %arg8[%c0_11, %c0_12] : memref<1x32xf32, #tpu.memory_space<vmem>>, vector<1x32xf32>
    %19 = vector.broadcast %18 : vector<1x32xf32> to vector<8x32xf32>
    %20 = arith.addf %17, %19 : vector<8x32xf32>
    %c0_13 = arith.constant 0 : index
    %c0_14 = arith.constant 0 : index
    %c0_15 = arith.constant 0 : index
    %21 = vector.load %arg9[%c0_13, %c0_14, %c0_15] : memref<1x8x32xf32, #tpu.memory_space<vmem>>, vector<1x8x32xf32>
    %22 = vector.shape_cast %21 : vector<1x8x32xf32> to vector<8x32xf32>
    %23 = vector.shape_cast %20 : vector<8x32xf32> to vector<1x8x32xf32>
    tpu.vector_store %arg9[%c0_13, %c0_14, %c0_15], %23 {strides = array<i32>} : memref<1x8x32xf32, #tpu.memory_space<vmem>>, vector<1x8x32xf32>,
    return
  }
  func.func @transform_0(%arg0: i32, %arg1: i32) -> i32 {
    %c0_i32 = arith.constant 0 : i32
    %c0_i32_0 = arith.constant 0 : i32
    return %c0_i32 : i32
  }
  func.func @transform_1(%arg0: i32, %arg1: i32) -> (i32, i32, i32) {
    %c0_i32 = arith.constant 0 : i32
    %c0_i32_0 = arith.constant 0 : i32
    return %arg0, %arg1, %c0_i32 : i32, i32, i32
  }
  func.func @transform_2(%arg0: i32, %arg1: i32) -> (i32, i32) {
    %c0_i32 = arith.constant 0 : i32
    %c0_i32_0 = arith.constant 0 : i32
    %c0_i32_1 = arith.constant 0 : i32
    return %c0_i32, %c0_i32_0 : i32, i32
  }
  func.func @transform_3(%arg0: i32, %arg1: i32) -> (i32, i32) {
    %c0_i32 = arith.constant 0 : i32
    %c0_i32_0 = arith.constant 0 : i32
    %c0_i32_1 = arith.constant 0 : i32
    return %c0_i32, %c0_i32_0 : i32, i32
  }
  func.func @transform_4(%arg0: i32, %arg1: i32) -> (i32, i32) {
    %c0_i32 = arith.constant 0 : i32
    %c0_i32_0 = arith.constant 0 : i32
    %c0_i32_1 = arith.constant 0 : i32
    return %c0_i32, %c0_i32_0 : i32, i32
  }
  func.func @transform_5(%arg0: i32, %arg1: i32) -> (i32, i32) {
    %c0_i32 = arith.constant 0 : i32
    %c0_i32_0 = arith.constant 0 : i32
    %c0_i32_1 = arith.constant 0 : i32
    return %c0_i32, %c0_i32_0 : i32, i32
  }
  func.func @transform_6(%arg0: i32, %arg1: i32) -> (i32, i32) {
    %c0_i32 = arith.constant 0 : i32
    %c0_i32_0 = arith.constant 0 : i32
    %c0_i32_1 = arith.constant 0 : i32
    return %c0_i32, %c0_i32_0 : i32, i32
  }
  func.func @transform_7(%arg0: i32, %arg1: i32) -> (i32, i32, i32) {
    %c0_i32 = arith.constant 0 : i32
    %c0_i32_0 = arith.constant 0 : i32
    return %arg0, %arg1, %c0_i32 : i32, i32, i32
  }
}

</mosaic_0001>

<bundles_post_ra>
// kernel: tpu_custom_call.1
= control target key start
LH: loop header
LB: loop body
LE: loop exit
PB: predicated region body
PF: predicated region fallthrough
CT: control target
= control target key end

     0   :  { %13 = vsyncpa [#allocation4], 0  ;;  %s439_s0 = inlined_call_operand.<no memory space> [shape: f32[1], index: 0, kind: input, shape index: {}]   ;;  %s440_s1 = inlined_call_operand.hbm [shape: f32[1,8,32], index: 1, kind: input, shape index: {}]   ;;  %s441_s2 = inlined_call_operand.hbm [shape: bf16[32,32], index: 2, kind: input, shape index: {}]   ;;  %s442_s3 = inlined_call_operand.vmem [shape: f32[1,32], index: 3, kind: input, shape index: {}]   ;;  %s443_s4 = inlined_call_operand.vmem [shape: f32[1,32], index: 4, kind: input, shape index: {}]   ;;  %s444_s5 = inlined_call_operand.vmem [shape: bf16[32,32], index: 5, kind: input, shape index: {}]   ;;  %s445_s6 = inlined_call_operand.vmem [shape: f32[1,32], index: 6, kind: input, shape index: {}]   ;;  %s446_s7 = inlined_call_operand.hbm [shape: f32[1,8,32], index: 7, kind: output, shape index: {}]  }
   0x1   :  { %14 = vsyncpa [#allocation7], 0 }
   0x2   :  { %15 = vsyncpa [#allocation5], 0  ;;  %s328_s24 = smov [#allocation3]   ;;  %s329_s26 = smov [#allocation6]  }
   0x3   :  { %s24_s25 = sshll.u32 %s328_s24, 4  ;;  %s33_s27 = sshll.u32 %s329_s26, 4  ;;  %s25_s25 = int_to_ptr.vmem [resolvable:$true] %s24_s25  ;;  %s375_s27 = int_to_ptr.vmem [resolvable:$true] %s33_s27 }
   0x4   :  { %s256_s30 = scalar_lea.hbm %s440_s1, 128 }
   0x5   :  { %p257_p0 = scmp.ne.s32.totalorder %s440_s1, %s256_s30  ;;  %p260_p1 = scmp.lt.u32.totalorder %s256_s30, %s440_s1 }
   0x7   :  { %p262_p2 = pnand %p260_p1, %p257_p0 }
   0x9   :  { %265 = shalt.err (!%p262_p2)
}
   0xa   :  { %s266_s12 = scalar_lea.vmem %s25_s25, 128  ;;  %p271_p4 = scmp.lt.s32.totalorder %s25_s25, %s25_s25 }
   0xb   :  { %p267_p3 = scmp.ne.s32.totalorder %s25_s25, %s266_s12  ;;  %p272_p5 = scmp.lt.s32.totalorder %s266_s12, %s266_s12 }
   0xd   :  { %p273_p6 = por %p272_p5, %p271_p4 }
   0xf   :  { %p274_p7 = pnand %p273_p6, %p267_p3 }
  0x11   :  { %277 = shalt.err (!%p274_p7)
}
  0x12   :  { %27 = dma.hbm_to_vmem [thread:$0]  %s440_s1, 128, %s25_s25, [#allocation4]  }
  0x13   :  { %s278_s17 = scalar_lea.hbm %s441_s2, 256 }
  0x14   :  { %p279_p8 = scmp.ne.s32.totalorder %s441_s2, %s278_s17  ;;  %p282_p9 = scmp.lt.u32.totalorder %s278_s17, %s441_s2 }
  0x16   :  { %p284_p10 = pnand %p282_p9, %p279_p8 }
  0x18   :  { %287 = shalt.err (!%p284_p10)
}
  0x19   :  { %s288_s22 = scalar_lea.vmem %s375_s27, 256  ;;  %p293_p12 = scmp.lt.s32.totalorder %s375_s27, %s375_s27 }
  0x1a   :  { %p289_p11 = scmp.ne.s32.totalorder %s375_s27, %s288_s22  ;;  %p294_p13 = scmp.lt.s32.totalorder %s288_s22, %s288_s22 }
  0x1c   :  { %p295_p0 = por %p294_p13, %p293_p12 }
  0x1e   :  { %p296_p1 = pnand %p295_p0, %p289_p11 }
  0x20   :  { %299 = shalt.err (!%p296_p1)
}
  0x21   :  { %s330_s1 = smov 64   ;;  %s331_s23 = smov 4  }
  0x22   :  { %39 = dma.hbm_to_vmem [thread:$0]  %s441_s2, 256, %s375_s27, [#allocation7], %s330_s1, %s330_s1, %s331_s23  }
  0x23   :  { %322 = dma.done.wait [#allocation4], 128  }
  0x24   :  { %323 = vsyncadd [#allocation4], 4294967168 }
  0x25   :  { %324 = dma.done.wait [#allocation7], 256  }
  0x26   :  { %325 = vsyncadd [#allocation7], 4294967040  ;;  %v332_v0 = vmov 0.0   ;;  %vm333_vm0 = vmmov 0   ;;  %v250_v1 = vld [vmem:[#allocation6] sm:$0xff]   ;;  %v251_v2 = vld [vmem:[#allocation6 + $0x8] sm:$0xff]   ;;  %v68_v7 = vlaneseq  ;;  %v64_v9 = vstv %s439_s0 }
  0x27   :  { %227 = vmatprep.subr.bf16.mxu0 %v332_v0  ;;  %231 = vmatprep.mubr.msk.bf16.mxu0 %vm333_vm0, %v332_v0  ;;  %v56_v3 = vld [vmem:[#allocation3] sm:$0xff]  ;;  %vm85_vm1 = vcmask 261120   ;;  %v253_v6 = vld [vmem:[%s444_s5 + $0x8] sm:$0xff]  }
  0x28   :  { %235 = vmatprep.subr.bf16.mxu1 %v332_v0  ;;  %239 = vmatprep.mubr.msk.bf16.mxu1 %vm333_vm0, %v332_v0  ;;  %v57_v4 = vpack.c.bf16 %v56_v3, %v56_v3  ;;  %v252_v5 = vld [vmem:[%s444_s5] sm:$0xff]   ;;  %v69_v11 = vshrl.u32 %v68_v7, 7  ;;  %s334_s5 = smov [#allocation8]  }
  0x29   :  { %228 = vmatpush3.bf16.msra.mxu0 %v250_v1  ;;  %236 = vmatpush3.bf16.msra.mxu1 %v252_v5  ;;  %v63_v8 = vld [vmem:[%s443_s4] sm:$0x1]  ;;  %s204_s12 = sshll.u32 %s334_s5, 4  ;;  %s205_s12 = int_to_ptr.vmem [resolvable:$true] %s204_s12 }
  0x2a   :  { %229 = vmatprep.subr.bf16.mxu0 %v332_v0  ;;  %237 = vmatprep.subr.bf16.mxu1 %v332_v0  ;;  %v65_v10 = vmul.f32 %v64_v9, %v63_v8  ;;  %v62_v12 = vld [vmem:[%s442_s3] sm:$0x1]  ;;  %v70_v14 = vsub.s32 0, %v69_v11  ;;  %s300_s3 = scalar_lea.vmem %s205_s12, 128  ;;  %p305_p3 = scmp.lt.s32.totalorder %s205_s12, %s205_s12 }
  0x2b   :  { %v217_v23 = vld [vmem:[%s445_s6] ss:$0 sm:$0xff]  ;;  %p301_p2 = scmp.ne.s32.totalorder %s205_s12, %s300_s3  ;;  %p306_p4 = scmp.lt.s32.totalorder %s300_s3, %s300_s3 }
  0x2c   :  { %v66_v13 = vadd.f32 %v65_v10, %v62_v12 }
  0x2d   :  { %230 = vmatpush3.bf16.msra.mxu0 %v251_v2  ;;  %238 = vmatpush3.bf16.msra.mxu1 %v253_v6  ;;  %p307_p5 = por %p306_p4, %p305_p3 }
  0x2e   :  { %v71_v15 = vrot.slane %v66_v13, %v70_v14 }
  0x2f   :  { %p308_p6 = pnand %p307_p5, %p301_p2 }
  0x30   :  { %232 = vmatmul.mubr.msk.bf16.vlgmr.msra.gmra.mrb[0].mxu0 %vm85_vm1, %v57_v4 }
 0x103   :  { %v123_v16 = vpop.f32.mrb[0].mxu0 }
 0x104   :  { %v124_v17 = vadd.f32 %v123_v16, %v71_v15  ;;  %v233_v18 = vpop.f32.mrb[1].mxu0 }
 0x105   :  { %v126_v19 = vpop.f32.mrb[2].mxu0 }
 0x106   :  { %254 = vtanh.f32 %v124_v17  ;;  %v234_v20 = vpop.f32.mrb[3].mxu0 }
 0x110   :  { %v255_v21 = vpop.eup %254 }
 0x111   :  { %v130_v22 = vpack.c.bf16 %v255_v21, %v255_v21 }
 0x113   :  { %240 = vmatmul.mubr.msk.bf16.vlgmr.msra.gmra.mrb[0].mxu1 %vm85_vm1, %v130_v22 }
 0x1e6   :  { %v191_v24 = vpop.f32.mrb[0].mxu1 }
 0x1e7   :  { %v192_v25 = vadd.f32 %v217_v23, %v191_v24  ;;  %v241_v26 = vpop.f32.mrb[1].mxu1 }
 0x1e8   :  { %v194_v27 = vpop.f32.mrb[2].mxu1 }
 0x1e9   :  { %197 = vst.msk [vmem:[#allocation8] sm:$0xff] %vm85_vm1, %v192_v25  ;;  %v242_v28 = vpop.f32.mrb[3].mxu1 }
 0x1ea   :  { %311 = shalt.err (!%p308_p6)
}
 0x1eb   :  { %s312_s6 = scalar_lea.hbm %s446_s7, 128 }
 0x1ec   :  { %p313_p7 = scmp.ne.s32.totalorder %s446_s7, %s312_s6  ;;  %p316_p8 = scmp.lt.u32.totalorder %s312_s6, %s446_s7 }
 0x1ee   :  { %p318_p9 = pnand %p316_p8, %p313_p7 }
 0x1f0   :  { %321 = shalt.err (!%p318_p9)
}
 0x1f1   :  { %207 = dma.vmem_to_hbm [thread:$0]  %s205_s12, 128, %s446_s7, [#allocation5]  }
 0x1f2   :  { %326 = dma.done.wait [#allocation5], 128  }
 0x1f3   :  { %327 = vsyncadd [#allocation5], 4294967168 }
 0x1f4   :  { %211 = vsyncpa [#allocation4], 1 }
 0x1f5   :  { %212 = vsyncpa [#allocation7], 1 }
 0x1f6   :  { %213 = vsyncpa [#allocation5], 1 }

</bundles_post_ra>
